<compile_context>
chip_gen: v6e
topology: v6e:2x2x1
jax: 0.10.0
libtpu: 0.0.40
codegen_flags: <defaults>
</compile_context>

<pallas_src>
import functools

import jax
import jax.numpy as jnp
from jax.experimental import pallas as pl
from jax.experimental.pallas import tpu as pltpu

FEATURES_DIM = 32        # stand-in for CHANNELS_NUM_IN_LAST_CONV[backbone]
FC_OUTPUT_DIM = 16
GEM_P = 3.0              # GeM p (learnable, init = 3) -- trace-time constant here
GEM_EPS = 1e-6           # GeM clamp eps
L2_EPS = 1e-12           # F.normalize eps

LANE = 128
SUBLANE = 8
MXU_DTYPE = jnp.float32  # jnp.bfloat16 recommended on v6e/v7x (f32 accumulate kept)


def _round_up(v, m):
    return (v + m - 1) // m * m


def _pick_spatial_tile(hw, cap=1024):
    """Largest legal spatial tile ((8,128) rule) that divides HW, capped."""
    if hw <= cap:
        return hw                              # full-dim block is always legal
    for t in range(cap, SUBLANE - 1, -1):
        if hw % t == 0 and t % SUBLANE == 0:
            return t
    return hw                                  # fallback: single full-HW tile


# ----------------------------- fused kernel --------------------------------

def _fused_cosplace_kernel(patches_ref, w1_ref, b1_ref, w2_ref, b2_ref,
                           out_ref, acc_ref, *, gem_p, hw_total):
    """One (batch, spatial-tile) step of the fused CosPlace forward."""
    m = pl.program_id(1)

    @pl.when(m == 0)
    def _init():
        acc_ref[...] = jnp.zeros_like(acc_ref)

    # ---- backbone conv stage: im2col matmul + bias + ReLU (MXU) ----
    x = jnp.dot(patches_ref[...].astype(MXU_DTYPE),
                w1_ref[...].astype(MXU_DTYPE),
                preferred_element_type=jnp.float32)              # (TM, C_PAD)
    x = jnp.maximum(x + b1_ref[...], 0.0)

    # ---- aggregation: per-pixel channel L2Norm (F.normalize, dim=1) ----
    ss = jnp.sum(x * x, axis=-1, keepdims=True)
    x = x * jax.lax.rsqrt(jnp.maximum(ss, L2_EPS * L2_EPS))      # == x / max(||x||, eps)

    # ---- GeM: clamp(eps)^p, spatial partial sum accumulated over m ----
    xc = jnp.maximum(x, GEM_EPS)
    if gem_p == 3.0:                                             # trace-time specialisation
        xp = xc * xc * xc                                        # VPU, no EUP exp/log
    else:
        xp = jnp.exp(gem_p * jnp.log(xc))

    tm_blk, cp = xp.shape
    if tm_blk % SUBLANE == 0:
        # sublane-blocked partial sum: pure elementwise VPU adds per tile
        acc_ref[...] += jnp.sum(xp.reshape(tm_blk // SUBLANE, SUBLANE, cp), axis=0)
    else:
        acc_ref[0:1, :] = acc_ref[0:1, :] + jnp.sum(xp, axis=0, keepdims=True)

    # ---- finalize on the last spatial tile ----
    @pl.when(m == pl.num_programs(1) - 1)
    def _finalize():
        g = jnp.sum(acc_ref[...], axis=0, keepdims=True)         # 8 -> 1 sublane reduce
        g = g * (1.0 / hw_total)                                 # GeM spatial mean
        g = jnp.exp(jnp.log(g) * (1.0 / gem_p))                  # ^(1/p); g > 0 by clamp
        y = jnp.dot(g.astype(MXU_DTYPE), w2_ref[...].astype(MXU_DTYPE),
                    preferred_element_type=jnp.float32) + b2_ref[...]   # Flatten+Linear
        n2 = jnp.sum(y * y, axis=-1, keepdims=True)
        y = y * jax.lax.rsqrt(jnp.maximum(n2, L2_EPS * L2_EPS))  # final L2Norm
        out_ref[...] = jnp.broadcast_to(y, out_ref.shape).astype(out_ref.dtype)


# ------------------------------ JAX wrappers --------------------------------

def _im2col_3x3_s2(x):
    """x: (N, C, H, W) -> patches (N, Ho*Wo, C*9) for conv 3x3, stride 2, pad 1."""
    n, c, h, w = x.shape
    ho = (h - 1) // 2 + 1            # matches PyTorch Conv2d(stride=2, padding=1)
    wo = (w - 1) // 2 + 1
    xp = jnp.pad(x, ((0, 0), (0, 0), (1, 1), (1, 1)))
    cols = []
    for ky in range(3):
        for kx in range(3):
            cols.append(xp[:, :, ky:ky + 2 * (ho - 1) + 1:2,
                               kx:kx + 2 * (wo - 1) + 1:2])      # (N, C, Ho, Wo)
    patches = jnp.stack(cols, axis=2).reshape(n, c * 9, ho * wo)
    patches = jnp.transpose(patches, (0, 2, 1))                  # (N, HW, C*9)
    return patches, (ho, wo)


@functools.partial(jax.jit, static_argnames=("gem_p",))
def geo_localization_net(x, conv_w, conv_b, fc_w, fc_b, *, gem_p=GEM_P):
    n = x.shape[0]
    c_out = conv_w.shape[0]
    d_out = fc_w.shape[0]

    # TODO(synk): im2col patches are still materialised in HBM by the wrapper
    # (acceptable for the stand-in backbone); a faithful backbone would stream
    # input row-tiles and do 9 accumulating taps inside the kernel instead.
    patches, (ho, wo) = _im2col_3x3_s2(x)
    hw = ho * wo
    k = patches.shape[-1]

    k_pad = _round_up(k, LANE)
    c_pad = _round_up(c_out, LANE)
    d_pad = _round_up(d_out, LANE)

    patches = jnp.pad(patches, ((0, 0), (0, 0), (0, k_pad - k)))
    w1 = jnp.pad(conv_w.reshape(c_out, k).T,
                 ((0, k_pad - k), (0, c_pad - c_out)))           # (K_PAD, C_PAD)
    b1 = jnp.pad(conv_b.reshape(1, c_out), ((0, 0), (0, c_pad - c_out)))
    w2 = jnp.pad(fc_w.T, ((0, c_pad - c_out), (0, d_pad - d_out)))  # (C_PAD, D_PAD)
    b2 = jnp.pad(fc_b.reshape(1, d_out), ((0, 0), (0, d_pad - d_out)))

    tm = _pick_spatial_tile(hw)
    num_m = hw // tm

    kernel = functools.partial(_fused_cosplace_kernel,
                               gem_p=float(gem_p), hw_total=float(hw))

    out = pl.pallas_call(
        kernel,
        out_shape=jax.ShapeDtypeStruct((n, SUBLANE, d_pad), jnp.float32),
        grid_spec=pltpu.PrefetchScalarGridSpec(
            num_scalar_prefetch=0,
            grid=(n, num_m),
            in_specs=[
                pl.BlockSpec((None, tm, k_pad), lambda b, m: (b, m, 0)),
                pl.BlockSpec((k_pad, c_pad), lambda b, m: (0, 0)),
                pl.BlockSpec((1, c_pad), lambda b, m: (0, 0)),
                pl.BlockSpec((c_pad, d_pad), lambda b, m: (0, 0)),
                pl.BlockSpec((1, d_pad), lambda b, m: (0, 0)),
            ],
            out_specs=pl.BlockSpec((None, SUBLANE, d_pad), lambda b, m: (b, 0, 0)),
            scratch_shapes=[pltpu.VMEM((SUBLANE, c_pad), jnp.float32)],
        ),
        compiler_params=pltpu.CompilerParams(
            dimension_semantics=("parallel", "arbitrary"),
            vmem_limit_bytes=32 * 1024 * 1024,
        ),
    )(patches, w1, b1, w2, b2)

    # drop the sublane replication rows and the lane padding
    return out[:, 0, :d_out]


def _reference_forward(x, conv_w, conv_b, fc_w, fc_b, p=GEM_P):
    """Pure-JAX reference of the same forward (for verification)."""
    feat = jax.lax.conv_general_dilated(
        x, conv_w, window_strides=(2, 2), padding=((1, 1), (1, 1)),
        dimension_numbers=("NCHW", "OIHW", "NCHW"))
    feat = jnp.maximum(feat + conv_b[None, :, None, None], 0.0)
    norm = jnp.sqrt(jnp.sum(feat * feat, axis=1, keepdims=True))
    feat = feat / jnp.maximum(norm, L2_EPS)                               # L2Norm(dim=1)
    g = jnp.mean(jnp.maximum(feat, GEM_EPS) ** p, axis=(2, 3)) ** (1.0 / p)  # GeM
    y = g @ fc_w.T + fc_b                                                 # Flatten+Linear
    n2 = jnp.sqrt(jnp.sum(y * y, axis=1, keepdims=True))
    return y / jnp.maximum(n2, L2_EPS)                                    # L2Norm


# --------------------------------- main -------------------------------------

if __name__ == "__main__":
    key = jax.random.PRNGKey(0)
    k_x, k_cw, k_cb, k_fw, k_fb = jax.random.split(key, 5)

    N, C_IN, H, W = 2, 4, 16, 16
    x = jax.random.normal(k_x, (N, C_IN, H, W), dtype=jnp.float32)

    conv_w = 0.1 * jax.random.normal(k_cw, (FEATURES_DIM, C_IN, 3, 3), jnp.float32)
    conv_b = 0.01 * jax.random.normal(k_cb, (FEATURES_DIM,), jnp.float32)
    fc_w = 0.1 * jax.random.normal(k_fw, (FC_OUTPUT_DIM, FEATURES_DIM), jnp.float32)
    fc_b = 0.01 * jax.random.normal(k_fb, (FC_OUTPUT_DIM,), jnp.float32)

    out = geo_localization_net(x, conv_w, conv_b, fc_w, fc_b)
    out = jax.block_until_ready(out)

    assert out.shape == (N, FC_OUTPUT_DIM)
    assert out.dtype == jnp.float32

    # Final L2Norm => every row has unit norm.
    norms = jnp.linalg.norm(out, axis=1)
    assert bool(jnp.all(jnp.abs(norms - 1.0) < 1e-4))

    # Fused kernel matches a pure-JAX reference of the same forward.
    ref = _reference_forward(x, conv_w, conv_b, fc_w, fc_b)
    assert bool(jnp.all(jnp.abs(out - ref) < 1e-4))

    print("KERNEL_OK")
</pallas_src>

<mosaic_0001>
module attributes {stable_mosaic.version = 11 : i64} {
  func.func @_fused_cosplace_kernel(%arg0: i32, %arg1: i32, %arg2: memref<1x64x128xf32, #tpu.memory_space<vmem>>, %arg3: memref<128x128xf32, #tpu.memory_space<vmem>>, %arg4: memref<1x128xf32, #tpu.memory_space<vmem>>, %arg5: memref<128x128xf32, #tpu.memory_space<vmem>>, %arg6: memref<1x128xf32, #tpu.memory_space<vmem>>, %arg7: memref<1x8x128xf32, #tpu.memory_space<vmem>>, %arg8: memref<8x128xf32, #tpu.memory_space<vmem>>) attributes {dimension_semantics = [#tpu.dimension_semantics<parallel>, #tpu.dimension_semantics<arbitrary>], iteration_bounds = array<i64: 2, 1>, scalar_prefetch = 0 : i64, scratch_operands = 1 : i64, tpu.core_type = #tpu.core_type<tc>, window_params = [{transform_indices = @transform_0, window_bounds = array<i64: 1, 64, 128>}, {pipeline_mode = #tpu.pipeline_mode<synchronous>, transform_indices = @transform_1, window_bounds = array<i64: 128, 128>}, {pipeline_mode = #tpu.pipeline_mode<synchronous>, transform_indices = @transform_2, window_bounds = array<i64: 1, 128>}, {pipeline_mode = #tpu.pipeline_mode<synchronous>, transform_indices = @transform_3, window_bounds = array<i64: 128, 128>}, {pipeline_mode = #tpu.pipeline_mode<synchronous>, transform_indices = @transform_4, window_bounds = array<i64: 1, 128>}, {transform_indices = @transform_5, window_bounds = array<i64: 1, 8, 128>}]} {
    %c0_i32 = arith.constant 0 : i32
    %0 = arith.cmpi eq, %arg1, %c0_i32 : i32
    %1 = arith.extui %0 : i1 to i32
    %c0_i32_0 = arith.constant 0 : i32
    %2 = arith.cmpi ne, %1, %c0_i32_0 : i32
    scf.if %2 {
      %cst_18 = arith.constant 0.000000e+00 : f32
      %32 = vector.broadcast %cst_18 : f32 to vector<8x128xf32>
      %c0_19 = arith.constant 0 : index
      %c0_20 = arith.constant 0 : index
      %33 = vector.load %arg8[%c0_19, %c0_20] : memref<8x128xf32, #tpu.memory_space<vmem>>, vector<8x128xf32>
      tpu.vector_store %arg8[%c0_19, %c0_20], %32 {strides = array<i32>} : memref<8x128xf32, #tpu.memory_space<vmem>>, vector<8x128xf32>,
    } else {
    }
    %c0 = arith.constant 0 : index
    %c0_1 = arith.constant 0 : index
    %c0_2 = arith.constant 0 : index
    %3 = vector.load %arg2[%c0, %c0_1, %c0_2] : memref<1x64x128xf32, #tpu.memory_space<vmem>>, vector<1x64x128xf32>
    %4 = vector.shape_cast %3 : vector<1x64x128xf32> to vector<64x128xf32>
    %c0_3 = arith.constant 0 : index
    %c0_4 = arith.constant 0 : index
    %5 = vector.load %arg3[%c0_3, %c0_4] : memref<128x128xf32, #tpu.memory_space<vmem>>, vector<128x128xf32>
    %cst = arith.constant dense<0.000000e+00> : vector<64x128xf32>
    %6 = tpu.matmul %4, %5, %cst {dimension_numbers = #tpu.dot_dimension_numbers<[1], [0], [0], [1], [0, 0, 1, 1], [], []>} : vector<64x128xf32>, vector<128x128xf32>, vector<64x128xf32> -> vector<64x128xf32>
    %c0_5 = arith.constant 0 : index
    %c0_6 = arith.constant 0 : index
    %7 = vector.load %arg4[%c0_5, %c0_6] : memref<1x128xf32, #tpu.memory_space<vmem>>, vector<1x128xf32>
    %8 = vector.broadcast %7 : vector<1x128xf32> to vector<64x128xf32>
    %9 = arith.addf %6, %8 : vector<64x128xf32>
    %cst_7 = arith.constant 0.000000e+00 : f32
    %10 = vector.broadcast %cst_7 : f32 to vector<64x128xf32>
    %11 = arith.maximumf %9, %10 : vector<64x128xf32>
    %12 = arith.mulf %11, %11 : vector<64x128xf32>
    %cst_8 = arith.constant dense<0.000000e+00> : vector<64xf32>
    %13 = vector.multi_reduction <add>, %12, %cst_8 [1] : vector<64x128xf32> to vector<64xf32>
    %14 = vector.shape_cast %13 : vector<64xf32> to vector<64x1xf32>
    %cst_9 = arith.constant 1.000000e-24 : f32
    %15 = vector.broadcast %cst_9 : f32 to vector<64x1xf32>
    %16 = arith.maximumf %14, %15 : vector<64x1xf32>
    %17 = math.rsqrt %16 : vector<64x1xf32>
    %18 = vector.broadcast %17 : vector<64x1xf32> to vector<64x128xf32>
    %19 = arith.mulf %11, %18 : vector<64x128xf32>
    %cst_10 = arith.constant 9.99999997E-7 : f32
    %20 = vector.broadcast %cst_10 : f32 to vector<64x128xf32>
    %21 = arith.maximumf %19, %20 : vector<64x128xf32>
    %22 = arith.mulf %21, %21 : vector<64x128xf32>
    %23 = arith.mulf %22, %21 : vector<64x128xf32>
    %c0_11 = arith.constant 0 : index
    %c0_12 = arith.constant 0 : index
    %24 = vector.load %arg8[%c0_11, %c0_12] : memref<8x128xf32, #tpu.memory_space<vmem>>, vector<8x128xf32>
    %25 = vector.shape_cast %23 : vector<64x128xf32> to vector<8x8x128xf32>
    %cst_13 = arith.constant dense<0.000000e+00> : vector<8x128xf32>
    %26 = vector.multi_reduction <add>, %25, %cst_13 [0] : vector<8x8x128xf32> to vector<8x128xf32>
    %27 = arith.addf %24, %26 : vector<8x128xf32>
    %c0_14 = arith.constant 0 : index
    %c0_15 = arith.constant 0 : index
    %28 = vector.load %arg8[%c0_14, %c0_15] : memref<8x128xf32, #tpu.memory_space<vmem>>, vector<8x128xf32>
    tpu.vector_store %arg8[%c0_14, %c0_15], %27 {strides = array<i32>} : memref<8x128xf32, #tpu.memory_space<vmem>>, vector<8x128xf32>,
    %c0_i32_16 = arith.constant 0 : i32
    %29 = arith.cmpi eq, %arg1, %c0_i32_16 : i32
    %30 = arith.extui %29 : i1 to i32
    %c0_i32_17 = arith.constant 0 : i32
    %31 = arith.cmpi ne, %30, %c0_i32_17 : i32
    scf.if %31 {
      %c0_18 = arith.constant 0 : index
      %c0_19 = arith.constant 0 : index
      %32 = vector.load %arg8[%c0_18, %c0_19] : memref<8x128xf32, #tpu.memory_space<vmem>>, vector<8x128xf32>
      %cst_20 = arith.constant dense<0.000000e+00> : vector<128xf32>
      %33 = vector.multi_reduction <add>, %32, %cst_20 [0] : vector<8x128xf32> to vector<128xf32>
      %34 = vector.shape_cast %33 : vector<128xf32> to vector<1x128xf32>
      %cst_21 = arith.constant 1.562500e-02 : f32
      %35 = vector.broadcast %cst_21 : f32 to vector<1x128xf32>
      %36 = arith.mulf %34, %35 : vector<1x128xf32>
      %37 = math.log %36 : vector<1x128xf32>
      %cst_22 = arith.constant 0.333333343 : f32
      %38 = vector.broadcast %cst_22 : f32 to vector<1x128xf32>
      %39 = arith.mulf %37, %38 : vector<1x128xf32>
      %40 = math.exp %39 : vector<1x128xf32>
      %c0_23 = arith.constant 0 : index
      %c0_24 = arith.constant 0 : index
      %41 = vector.load %arg5[%c0_23, %c0_24] : memref<128x128xf32, #tpu.memory_space<vmem>>, vector<128x128xf32>
      %cst_25 = arith.constant dense<0.000000e+00> : vector<1x128xf32>
      %42 = tpu.matmul %40, %41, %cst_25 {dimension_numbers = #tpu.dot_dimension_numbers<[1], [0], [0], [1], [0, 0, 1, 1], [], []>} : vector<1x128xf32>, vector<128x128xf32>, vector<1x128xf32> -> vector<1x128xf32>
      %c0_26 = arith.constant 0 : index
      %c0_27 = arith.constant 0 : index
      %43 = vector.load %arg6[%c0_26, %c0_27] : memref<1x128xf32, #tpu.memory_space<vmem>>, vector<1x128xf32>
      %44 = arith.addf %42, %43 : vector<1x128xf32>
      %45 = arith.mulf %44, %44 : vector<1x128xf32>
      %cst_28 = arith.constant dense<0.000000e+00> : vector<1xf32>
      %46 = vector.multi_reduction <add>, %45, %cst_28 [1] : vector<1x128xf32> to vector<1xf32>
      %47 = vector.shape_cast %46 : vector<1xf32> to vector<1x1xf32>
      %cst_29 = arith.constant 1.000000e-24 : f32
      %48 = vector.broadcast %cst_29 : f32 to vector<1x1xf32>
      %49 = arith.maximumf %47, %48 : vector<1x1xf32>
      %50 = math.rsqrt %49 : vector<1x1xf32>
      %51 = vector.broadcast %50 : vector<1x1xf32> to vector<1x128xf32>
      %52 = arith.mulf %44, %51 : vector<1x128xf32>
      %53 = vector.shape_cast %52 : vector<1x128xf32> to vector<1x128xf32>
      %54 = vector.broadcast %53 : vector<1x128xf32> to vector<8x128xf32>
      %c0_30 = arith.constant 0 : index
      %c0_31 = arith.constant 0 : index
      %c0_32 = arith.constant 0 : index
      %55 = vector.load %arg7[%c0_30, %c0_31, %c0_32] : memref<1x8x128xf32, #tpu.memory_space<vmem>>, vector<1x8x128xf32>
      %56 = vector.shape_cast %55 : vector<1x8x128xf32> to vector<8x128xf32>
      %57 = vector.shape_cast %54 : vector<8x128xf32> to vector<1x8x128xf32>
      tpu.vector_store %arg7[%c0_30, %c0_31, %c0_32], %57 {strides = array<i32>} : memref<1x8x128xf32, #tpu.memory_space<vmem>>, vector<1x8x128xf32>,
    } else {
    }
    return
  }
  func.func @transform_0(%arg0: i32, %arg1: i32) -> (i32, i32, i32) {
    %c0_i32 = arith.constant 0 : i32
    %c0_i32_0 = arith.constant 0 : i32
    return %arg0, %arg1, %c0_i32 : i32, i32, i32
  }
  func.func @transform_1(%arg0: i32, %arg1: i32) -> (i32, i32) {
    %c0_i32 = arith.constant 0 : i32
    %c0_i32_0 = arith.constant 0 : i32
    %c0_i32_1 = arith.constant 0 : i32
    return %c0_i32, %c0_i32_0 : i32, i32
  }
  func.func @transform_2(%arg0: i32, %arg1: i32) -> (i32, i32) {
    %c0_i32 = arith.constant 0 : i32
    %c0_i32_0 = arith.constant 0 : i32
    %c0_i32_1 = arith.constant 0 : i32
    return %c0_i32, %c0_i32_0 : i32, i32
  }
  func.func @transform_3(%arg0: i32, %arg1: i32) -> (i32, i32) {
    %c0_i32 = arith.constant 0 : i32
    %c0_i32_0 = arith.constant 0 : i32
    %c0_i32_1 = arith.constant 0 : i32
    return %c0_i32, %c0_i32_0 : i32, i32
  }
  func.func @transform_4(%arg0: i32, %arg1: i32) -> (i32, i32) {
    %c0_i32 = arith.constant 0 : i32
    %c0_i32_0 = arith.constant 0 : i32
    %c0_i32_1 = arith.constant 0 : i32
    return %c0_i32, %c0_i32_0 : i32, i32
  }
  func.func @transform_5(%arg0: i32, %arg1: i32) -> (i32, i32, i32) {
    %c0_i32 = arith.constant 0 : i32
    %c0_i32_0 = arith.constant 0 : i32
    %c0_i32_1 = arith.constant 0 : i32
    return %arg0, %c0_i32, %c0_i32_0 : i32, i32, i32
  }
}

</mosaic_0001>

<bundles_post_ra>
// kernel: geo_localization_net.1
= control target key start
LH: loop header
LB: loop body
LE: loop exit
PB: predicated region body
PF: predicated region fallthrough
CT: control target
= control target key end

     0   :  { %s901_s18 = smov 0   ;;  %s903_s19 = smov 0   ;;  %s1090_s0 = inlined_call_operand.vmem [shape: f32[2,64,128], index: 0, kind: input, shape index: {}]   ;;  %s1091_s1 = inlined_call_operand.vmem [shape: f32[128,128], index: 1, kind: input, shape index: {}]   ;;  %s1092_s2 = inlined_call_operand.vmem [shape: f32[1,128], index: 2, kind: input, shape index: {}]   ;;  %s1093_s3 = inlined_call_operand.vmem [shape: f32[128,128], index: 3, kind: input, shape index: {}]   ;;  %s1094_s4 = inlined_call_operand.vmem [shape: f32[1,128], index: 4, kind: input, shape index: {}]   ;;  %s1095_s5 = inlined_call_operand.vmem [shape: f32[2,8,128], index: 5, kind: output, shape index: {}]  }
   0x1   :  { %s905_s20 = smov 0  }
   0x2 LB: > { %s27_s21 = sadd.s32 1, %s863_s19  ;;  %p669_p0 = scmp.ge.s32.totalorder %s867_s20, 1  ;;  %s867_s20 = sphi %s905_s20, %s15_s20   ;;  %s863_s19 = sphi %s903_s19, %s1097_s19   ;;  %s859_s18 = sphi %s901_s18, %s1096_s18  }
   0x3   : > { %p29_p1 = scmp.ge.s32.totalorder %s27_s21, 2  ;;  %p206_p2 = scmp.lt.s32.totalorder %s867_s20, 3 }
   0x5   : > { %s1099_s21 = smov (%p29_p1, %s27_s21), 0  ;;  %p207_p3 = pnand %p669_p0, %p206_p2 }
   0x6   : > { %p238_p4 = scmp.lt.s32.totalorder (!%p207_p3), %s859_s18, 1 }
   0x7   : > { %210 = sbr.rel (%p207_p3) target bundleno = 832 (0x340), region = 40 }
   0xc   : > { %v279_v0 = vld [vmem:[%s1091_s1 + $0x78] sm:$0xff]  ;;  %v278_v1 = vld [vmem:[%s1091_s1 + $0x70] sm:$0xff]  ;;  %v277_v2 = vld [vmem:[%s1091_s1 + $0x68] sm:$0xff]  ;;  %s1101_s18 = smov (!%p238_p4, %s859_s18), 1  ;;  %v869_v57 = vmov 0.0   ;;  %vm870_vm0 = vmmov 0  }
   0xd   : > { %718 = vmatprep.subr.mxu0 %v279_v0  ;;  %v276_v3 = vld [vmem:[%s1091_s1 + $0x60] sm:$0xff]  ;;  %s676_s30 = sshll.u32 %s1101_s18, 6  ;;  %v275_v4 = vld [vmem:[%s1091_s1 + $0x58] sm:$0xff]  ;;  %v274_v6 = vld [vmem:[%s1091_s1 + $0x50] sm:$0xff]  ;;  %762 = vmatprep.subr.mxu1 %v869_v57  ;;  %vm586_vm1 = vcmask 1040384   ;;  %s672_s6 = sshll.u32 %s1101_s18, 3 }
   0xe   : > { %719 = vmatpush3.msra.mxu0 %v279_v0  ;;  %s937_s8 = scalar_lea.vmem %s1090_s0, %s676_s30  ;;  %v273_v7 = vld [vmem:[%s1091_s1 + $0x48] sm:$0xff]  ;;  %v272_v8 = vld [vmem:[%s1091_s1 + $0x40] sm:$0xff]  ;;  %v271_v9 = vld [vmem:[%s1091_s1 + $0x38] sm:$0xff]  ;;  %794 = vmatprep.mubr.msk.f32.mxu1 %vm870_vm0, %v869_v57  ;;  %s250_s10 = scalar_lea.vmem %s1095_s5, %s672_s6 }
   0xf   : > { %720 = vmatprep.subr.mxu0 %v278_v1  ;;  %v256_v5 = vld [vmem:[%s937_s8] sm:$0xff]  ;;  %v270_v10 = vld [vmem:[%s1091_s1 + $0x30] sm:$0xff]  ;;  %v269_v11 = vld [vmem:[%s1091_s1 + $0x28] sm:$0xff] }
  0x10   : > { %721 = vmatpush3.msra.mxu0 %v278_v1  ;;  %750 = vmatprep.mubr.f32.mxu0 %v256_v5  ;;  %v268_v12 = vld [vmem:[%s1091_s1 + $0x20] sm:$0xff]  ;;  %v267_v13 = vld [vmem:[%s1091_s1 + $0x18] sm:$0xff]  ;;  %v266_v14 = vld [vmem:[%s1091_s1 + $0x10] sm:$0xff] }
  0x11   : > { %722 = vmatprep.subr.mxu0 %v277_v2  ;;  %v265_v15 = vld [vmem:[%s1091_s1 + $0x8] sm:$0xff]  ;;  %v264_v16 = vld [vmem:[%s1091_s1] sm:$0xff]  ;;  %v258_v18 = vld [vmem:[%s937_s8 + $0x10] sm:$0xff] }
  0x12   : > { %723 = vmatpush3.msra.mxu0 %v277_v2  ;;  %v257_v17 = vld [vmem:[%s937_s8 + $0x8] sm:$0xff]  ;;  %v259_v19 = vld [vmem:[%s937_s8 + $0x18] sm:$0xff]  ;;  %v260_v20 = vld [vmem:[%s937_s8 + $0x20] sm:$0xff] }
  0x13   : > { %724 = vmatprep.subr.mxu0 %v276_v3  ;;  %v261_v21 = vld [vmem:[%s937_s8 + $0x28] sm:$0xff]  ;;  %v262_v22 = vld [vmem:[%s937_s8 + $0x30] sm:$0xff]  ;;  %v263_v23 = vld [vmem:[%s937_s8 + $0x38] sm:$0xff] }
  0x14   : > { %725 = vmatpush3.msra.mxu0 %v276_v3  ;;  %v673_v25 = vld [vmem:[%s1092_s2] ss:$0 sm:$0xff]  ;;  %v513_v58 = vld [vmem:[%s1093_s3 + $0x78] sm:$0xff]  ;;  %v512_v59 = vld [vmem:[%s1093_s3 + $0x70] sm:$0xff] }
  0x15   : > { %726 = vmatprep.subr.mxu0 %v275_v4  ;;  %763 = vmatpush3.msra.mxu1 %v513_v58  ;;  %v511_v60 = vld [vmem:[%s1093_s3 + $0x68] sm:$0xff]  ;;  %v510_v61 = vld [vmem:[%s1093_s3 + $0x60] sm:$0xff]  ;;  %v509_v62 = vld [vmem:[%s1093_s3 + $0x58] sm:$0xff] }
  0x16   : > { %727 = vmatpush3.msra.mxu0 %v275_v4  ;;  %764 = vmatprep.subr.mxu1 %v869_v57  ;;  %v508_v63 = vld [vmem:[%s1093_s3 + $0x50] sm:$0xff]  ;;  %v507_v0 = vld [vmem:[%s1093_s3 + $0x48] sm:$0xff]  ;;  %v506_v1 = vld [vmem:[%s1093_s3 + $0x40] sm:$0xff] }
  0x17   : > { %728 = vmatprep.subr.mxu0 %v274_v6  ;;  %765 = vmatpush3.msra.mxu1 %v512_v59  ;;  %v505_v2 = vld [vmem:[%s1093_s3 + $0x38] sm:$0xff]  ;;  %v504_v3 = vld [vmem:[%s1093_s3 + $0x30] sm:$0xff]  ;;  %v503_v4 = vld [vmem:[%s1093_s3 + $0x28] sm:$0xff] }
  0x18   : > { %729 = vmatpush3.msra.mxu0 %v274_v6  ;;  %766 = vmatprep.subr.mxu1 %v869_v57  ;;  %v502_v5 = vld [vmem:[%s1093_s3 + $0x20] sm:$0xff]  ;;  %v501_v6 = vld [vmem:[%s1093_s3 + $0x18] sm:$0xff] }
  0x19   : > { %730 = vmatprep.subr.mxu0 %v273_v7  ;;  %767 = vmatpush3.msra.mxu1 %v511_v60 }
  0x1a   : > { %731 = vmatpush3.msra.mxu0 %v273_v7  ;;  %768 = vmatprep.subr.mxu1 %v869_v57  ;;  %v500_v7 = vld [vmem:[%s1093_s3 + $0x10] sm:$0xff] }
  0x1b   : > { %732 = vmatprep.subr.mxu0 %v272_v8  ;;  %769 = vmatpush3.msra.mxu1 %v510_v61 }
  0x1c   : > { %733 = vmatpush3.msra.mxu0 %v272_v8  ;;  %770 = vmatprep.subr.mxu1 %v869_v57  ;;  %v499_v8 = vld [vmem:[%s1093_s3 + $0x8] sm:$0xff] }
  0x1d   : > { %734 = vmatprep.subr.mxu0 %v271_v9  ;;  %771 = vmatpush3.msra.mxu1 %v509_v62 }
  0x1e   : > { %735 = vmatpush3.msra.mxu0 %v271_v9  ;;  %772 = vmatprep.subr.mxu1 %v869_v57  ;;  %v498_v9 = vld [vmem:[%s1093_s3] sm:$0xff] }
  0x1f   : > { %736 = vmatprep.subr.mxu0 %v270_v10  ;;  %773 = vmatpush3.msra.mxu1 %v508_v63 }
  0x20   : > { %737 = vmatpush3.msra.mxu0 %v270_v10  ;;  %774 = vmatprep.subr.mxu1 %v869_v57 }
  0x21   : > { %738 = vmatprep.subr.mxu0 %v269_v11  ;;  %775 = vmatpush3.msra.mxu1 %v507_v0 }
  0x22   : > { %739 = vmatpush3.msra.mxu0 %v269_v11  ;;  %776 = vmatprep.subr.mxu1 %v869_v57 }
  0x23   : > { %740 = vmatprep.subr.mxu0 %v268_v12  ;;  %777 = vmatpush3.msra.mxu1 %v506_v1 }
  0x24   : > { %741 = vmatpush3.msra.mxu0 %v268_v12  ;;  %778 = vmatprep.subr.mxu1 %v869_v57 }
  0x25   : > { %742 = vmatprep.subr.mxu0 %v267_v13  ;;  %779 = vmatpush3.msra.mxu1 %v505_v2 }
  0x26   : > { %743 = vmatpush3.msra.mxu0 %v267_v13  ;;  %780 = vmatprep.subr.mxu1 %v869_v57 }
  0x27   : > { %744 = vmatprep.subr.mxu0 %v266_v14  ;;  %781 = vmatpush3.msra.mxu1 %v504_v3 }
  0x28   : > { %745 = vmatpush3.msra.mxu0 %v266_v14  ;;  %782 = vmatprep.subr.mxu1 %v869_v57 }
  0x29   : > { %746 = vmatprep.subr.mxu0 %v265_v15  ;;  %783 = vmatpush3.msra.mxu1 %v503_v4 }
  0x2a   : > { %747 = vmatpush3.msra.mxu0 %v265_v15  ;;  %784 = vmatprep.subr.mxu1 %v869_v57 }
  0x2b   : > { %748 = vmatprep.subr.mxu0 %v264_v16  ;;  %785 = vmatpush3.msra.mxu1 %v502_v5 }
  0x2c   : > { %749 = vmatpush3.msra.mxu0 %v264_v16  ;;  %786 = vmatprep.subr.mxu1 %v869_v57 }
  0x2d   : > { %751 = vmatmul.mubr.f32.vlgmr.msra.gmra.mxu0 %v257_v17  ;;  %787 = vmatpush3.msra.mxu1 %v501_v6 }
  0x2e   : > { %753 = vmatprep.mubr.f32.mxu0 %v258_v18  ;;  %788 = vmatprep.subr.mxu1 %v869_v57 }
  0x2f   : > { %789 = vmatpush3.msra.mxu1 %v500_v7 }
  0x30   : > { %790 = vmatprep.subr.mxu1 %v869_v57 }
  0x31   : > { %754 = vmatmul.mubr.f32.gmra.mxu0 %v259_v19  ;;  %791 = vmatpush3.msra.mxu1 %v499_v8 }
  0x32   : > { %756 = vmatprep.mubr.f32.mxu0 %v260_v20  ;;  %792 = vmatprep.subr.mxu1 %v869_v57 }
  0x33   : > { %793 = vmatpush3.msra.mxu1 %v498_v9 }
  0x35   : > { %757 = vmatmul.mubr.f32.gmra.mxu0 %v261_v21 }
  0x36   : > { %759 = vmatprep.mubr.f32.mxu0 %v262_v22 }
  0x39   : > { %760 = vmatmul.mubr.f32.gmra.mxu0 %v263_v23 }
  0xed   : > { %v752_v24 = vpop.f32.mrf.mxu0 }
  0xee   : > { %v359_v27 = vadd.f32 %v752_v24, %v673_v25 }
  0xef   : > { %v353_v26 = vpop.f32.mrf.mxu0 }
  0xf0   : > { %v354_v28 = vadd.f32 %v673_v25, %v353_v26  ;;  %v988_v33 = vmax.f32 %v359_v27, 0.0 }
  0xf1   : > { %v755_v29 = vpop.f32.mrf.mxu0 }
  0xf2   : > { %v986_v30 = vmax.f32 %v354_v28, 0.0  ;;  %v369_v31 = vadd.f32 %v755_v29, %v673_v25  ;;  %v401_v43 = vmul.f32 %v988_v33, %v988_v33 }
  0xf3   : > { %v363_v32 = vpop.f32.mrf.mxu0 }
  0xf4   : > { %v364_v34 = vadd.f32 %v673_v25, %v363_v32  ;;  %v400_v35 = vmul.f32 %v986_v30, %v986_v30  ;;  %v994_v38 = vmax.f32 %v369_v31, 0.0 }
  0xf5   : > { %v758_v36 = vpop.f32.mrf.mxu0 }
  0xf6   : > { %v992_v37 = vmax.f32 %v364_v34, 0.0  ;;  %408 = vadd.xlane.f32.xlu0 %v400_v35  ;;  %v379_v40 = vadd.f32 %v758_v36, %v673_v25  ;;  %v403_v47 = vmul.f32 %v994_v38, %v994_v38 }
  0xf7   : > { %v373_v39 = vpop.f32.mrf.mxu0 }
  0xf8   : > { %v374_v41 = vadd.f32 %v673_v25, %v373_v39  ;;  %v402_v42 = vmul.f32 %v992_v37, %v992_v37  ;;  %v1004_v48 = vmax.f32 %v379_v40, 0.0 }
  0xf9   : > { %v761_v44 = vpop.f32.mrf.mxu0 }
  0xfa   : > { %v1000_v45 = vmax.f32 %v374_v41, 0.0  ;;  %412 = vadd.xlane.f32.xlu1 %v402_v42  ;;  %410 = vadd.xlane.f32.xlu0 %v401_v43  ;;  %v389_v49 = vadd.f32 %v761_v44, %v673_v25  ;;  %v405_v54 = vmul.f32 %v1004_v48, %v1004_v48 }
  0xfb   : > { %v383_v46 = vpop.f32.mrf.mxu0 }
  0xfc   : > { %v384_v50 = vadd.f32 %v673_v25, %v383_v46  ;;  %v404_v51 = vmul.f32 %v1000_v45, %v1000_v45  ;;  %v1010_v53 = vmax.f32 %v389_v49, 0.0 }
  0xfe   : > { %v1008_v52 = vmax.f32 %v384_v50, 0.0  ;;  %414 = vadd.xlane.f32.xlu1 %v403_v47  ;;  %416 = vadd.xlane.f32.xlu0 %v404_v51  ;;  %v407_v56 = vmul.f32 %v1010_v53, %v1010_v53 }
 0x100   : > { %v406_v55 = vmul.f32 %v1008_v52, %v1008_v52 }
 0x102   : > { %418 = vadd.xlane.f32.xlu1 %v405_v54  ;;  %420 = vadd.xlane.f32.xlu0 %v406_v55 }
 0x106   : > { %422 = vadd.xlane.f32.xlu1 %v407_v56 }
 0x17f   : > { %v409_v10 = vpop.xlane.xlu0 %408 }
 0x180   : > { %v424_v11 = vmax.f32 %v409_v10, 1e-24 }
 0x182   : > { %823 = vrsqrt.f32 %v424_v11 }
 0x183   : > { %v413_v12 = vpop.xlane.xlu1 %412  ;;  %v411_v13 = vpop.xlane.xlu0 %410 }
 0x184   : > { %v426_v14 = vmax.f32 %v413_v12, 1e-24  ;;  %v425_v15 = vmax.f32 %v411_v13, 1e-24 }
 0x186   : > { %825 = vrsqrt.f32 %v426_v14 }
 0x187   : > { %827 = vrsqrt.f32 %v425_v15  ;;  %v415_v16 = vpop.xlane.xlu1 %414  ;;  %v417_v17 = vpop.xlane.xlu0 %416 }
 0x188   : > { %v427_v18 = vmax.f32 %v415_v16, 1e-24  ;;  %v428_v19 = vmax.f32 %v417_v17, 1e-24 }
 0x18a   : > { %829 = vrsqrt.f32 %v427_v18 }
 0x18b   : > { %831 = vrsqrt.f32 %v428_v19  ;;  %v419_v20 = vpop.xlane.xlu1 %418  ;;  %v421_v21 = vpop.xlane.xlu0 %420 }
 0x18c   : > { %v429_v22 = vmax.f32 %v419_v20, 1e-24  ;;  %v430_v23 = vmax.f32 %v421_v21, 1e-24  ;;  %v514_v21 = vld [vmem:[%s1094_s4] sm:$0x1] }
 0x18e   : > { %833 = vrsqrt.f32 %v429_v22 }
 0x18f   : > { %v824_v24 = vpop.eup %823  ;;  %835 = vrsqrt.f32 %v430_v23  ;;  %v423_v25 = vpop.xlane.xlu1 %422 }
 0x190   : > { %v440_v26 = vmul.f32 %v824_v24, %v986_v30  ;;  %v431_v27 = vmax.f32 %v423_v25, 1e-24 }
 0x192   : > { %837 = vrsqrt.f32 %v431_v27  ;;  %v448_v29 = vmax.f32 %v440_v26, 1e-06 }
 0x193   : > { %v826_v28 = vpop.eup %825 }
 0x194   : > { %v828_v31 = vpop.eup %827  ;;  %v442_v32 = vmul.f32 %v826_v28, %v992_v37  ;;  %v456_v39 = vmul.f32 %v448_v29, %v448_v29 }
 0x195   : > { %v441_v34 = vmul.f32 %v828_v31, %v988_v33 }
 0x196   : > { %v450_v35 = vmax.f32 %v442_v32, 1e-06  ;;  %v464_v49 = vmul.f32 %v456_v39, %v448_v29  ;;  %v593_v29 = vlaneseq }
 0x197   : > { %v830_v36 = vpop.eup %829  ;;  %v449_v40 = vmax.f32 %v441_v34, 1e-06 }
 0x198   : > { %v832_v41 = vpop.eup %831  ;;  %v443_v42 = vmul.f32 %v830_v36, %v994_v38  ;;  %v458_v43 = vmul.f32 %v450_v35, %v450_v35  ;;  %v594_v31 = vshrl.u32 %v593_v29, 7 }
 0x199   : > { %v457_v44 = vmul.f32 %v449_v40, %v449_v40  ;;  %v444_v30 = vmul.f32 %v832_v41, %v1000_v45 }
 0x19a   : > { %v451_v46 = vmax.f32 %v443_v42, 1e-06  ;;  %v466_v55 = vmul.f32 %v458_v43, %v450_v35  ;;  %v595_v32 = vsub.s32 0, %v594_v31 }
 0x19b   : > { %v834_v47 = vpop.eup %833  ;;  %v465_v50 = vmul.f32 %v457_v44, %v449_v40  ;;  %v452_v51 = vmax.f32 %v444_v30, 1e-06 }
 0x19c   : > { %v836_v54 = vpop.eup %835  ;;  %v459_v37 = vmul.f32 %v451_v46, %v451_v46  ;;  %v445_v33 = vmul.f32 %v834_v47, %v1004_v48 }
 0x19d   : > { %v473_v56 = vadd.f32 %v465_v50, %v464_v49  ;;  %v460_v57 = vmul.f32 %v452_v51, %v452_v51  ;;  %v446_v58 = vmul.f32 %v836_v54, %v1008_v52 }
 0x19e   : > { %v467_v59 = vmul.f32 %v459_v37, %v451_v46  ;;  %v453_v38 = vmax.f32 %v445_v33, 1e-06 }
 0x19f   : > { %v838_v60 = vpop.eup %837  ;;  %v474_v61 = vadd.f32 %v473_v56, %v466_v55  ;;  %v454_v62 = vmax.f32 %v446_v58, 1e-06  ;;  %v468_v1 = vmul.f32 %v460_v57, %v452_v51 }
 0x1a0   : > { %v461_v45 = vmul.f32 %v453_v38, %v453_v38  ;;  %v447_v63 = vmul.f32 %v838_v60, %v1010_v53 }
 0x1a1   : > { %v475_v0 = vadd.f32 %v474_v61, %v467_v59  ;;  %v462_v2 = vmul.f32 %v454_v62, %v454_v62 }
 0x1a2   : > { %v469_v3 = vmul.f32 %v461_v45, %v453_v38  ;;  %v455_v4 = vmax.f32 %v447_v63, 1e-06 }
 0x1a3   : > { %v476_v5 = vadd.f32 %v475_v0, %v468_v1  ;;  %v470_v7 = vmul.f32 %v462_v2, %v454_v62 }
 0x1a4   : > { %v463_v48 = vmul.f32 %v455_v4, %v455_v4 }
 0x1a5   : > { %v477_v6 = vadd.f32 %v476_v5, %v469_v3 }
 0x1a6   : > { %v471_v8 = vmul.f32 %v463_v48, %v455_v4 }
 0x1a7   : > { %v478_v9 = vadd.f32 %v477_v6, %v470_v7 }
 0x1a9   : > { %v479_v52 = vadd.f32 %v478_v9, %v471_v8 }
 0x1ab   : > { %v486_v10 = vrot.slane %v479_v52, 4 }
 0x1ad   : > { %v487_v11 = vadd.f32 %v486_v10, %v479_v52 }
 0x1af   : > { %v488_v12 = vrot.slane %v487_v11, 2 }
 0x1b1   : > { %v489_v13 = vadd.f32 %v488_v12, %v487_v11 }
 0x1b3   : > { %v490_v14 = vrot.slane %v489_v13, 1 }
 0x1b5   : > { %v491_v15 = vadd.f32 %v490_v14, %v489_v13 }
 0x1b7   : > { %v492_v16 = vmul.f32 0.015625, %v491_v15 }
 0x1b9   : > { %839 = vlog2.f32 %v492_v16 }
 0x1c6   : > { %v840_v53 = vpop.eup %839 }
 0x1c7   : > { %v494_v17 = vmul.f32 0.6931472, %v840_v53 }
 0x1c9   : > { %v495_v18 = vmul.f32 0.33333334, %v494_v17 }
 0x1cb   : > { %v496_v19 = vmul.f32 1.442695, %v495_v18 }
 0x1cd   : > { %841 = vpow2.f32 %v496_v19 }
 0x1da   : > { %v842_v20 = vpop.eup %841 }
 0x1db   : > { %795 = vmatmul.mubr.f32.vlgmr.msra.gmra.mxu1 %v842_v20 }
 0x29b   : > { %v581_v22 = vpop.f32.mrf.mxu1 }
 0x29c   : > { %v582_v23 = vadd.f32 %v581_v22, %v514_v21 }
 0x29d   : > { %v796_v24 = vpop.f32.mrf.mxu1 }
 0x29e   : > { %v585_v25 = vmul.f32 %v582_v23, %v582_v23 }
 0x2a0   : > { %v587_v26 = vsel %vm586_vm1, %v585_v25, 0.0 }
 0x2a1   : > { %588 = vadd.xlane.f32.xlu0 %v587_v26 }
 0x32a   : > { %v589_v27 = vpop.xlane.xlu0 %588 }
 0x32b   : > { %v590_v28 = vmax.f32 %v589_v27, 1e-24 }
 0x32d   : > { %843 = vrsqrt.f32 %v590_v28 }
 0x33a   : > { %v844_v34 = vpop.eup %843 }
 0x33b   : > { %v592_v35 = vmul.f32 %v844_v34, %v582_v23 }
 0x33d   : > { %v596_v36 = vrot.slane %v592_v35, %v595_v32 }
 0x33f   : > { %597 = vst [vmem:[%s250_s10] sm:$0xff] %v596_v36 }
 0x340 PF: > { %s15_s20 = sadd.s32 1, %s867_s20   ;;  %s1096_s18 = smov %s863_s19 }
 0x341   : > { %p12_p5 = scmp.ge.s32.totalorder %s15_s20, 4   ;;  %s1097_s19 = smov %s1099_s21 }
 0x343   :  { %14 = sbr.rel (!%p12_p5) target bundleno = 2 (0x2), region = 78 }

</bundles_post_ra>
